<compile_context>
chip_gen: v7x
topology: tpu7x:2x2x1
jax: 0.10.0
libtpu: 0.0.40
codegen_flags: <defaults>
</compile_context>

<pallas_src>
import functools

import numpy as np
import jax
import jax.numpy as jnp
from jax import lax
from jax.experimental import pallas as pl
from jax.experimental.pallas import tpu as pltpu

SMOOTH = 0.001

MAX_TILE_PX = 256 * 1024        # caps the (Th, Tw) f32 working slabs (~1 MiB each)
IN_BUDGET = 16 * 1024 * 1024    # double-buffered input-pipeline byte budget
VMEM_LIMIT = 32 * 1024 * 1024   # raises v5e's 16 MiB scoped default; safe on v7x


def _make_kernel(C, Th, Tw, H, W, hb_local, hb_total, ragged_h, ragged_w):
    f32 = jnp.float32
    needs_mask = ragged_h or ragged_w

    if Th % 8 == 0:
        def reduce_rows(x):            # (Th, Tw) -> (8, Tw); pure VALU vreg-row adds
            r = x[0:8, :]
            for i in range(1, Th // 8):
                r = r + x[i * 8:(i + 1) * 8, :]
            return r
    else:                              # tiny full-extent tile (Th == H < 8)
        def reduce_rows(x):
            return x

    def kernel(logits_ref, semseg_ref, out_ref, acc_ref):
        h = pl.program_id(2)
        w = pl.program_id(3)

        @pl.when((h == 0) & (w == 0))
        def _():
            acc_ref[...] = jnp.zeros_like(acc_ref)

        # Blocks are (C, Th, Tw): channels lead, so every per-pixel channel
        # reduction is a short chain of elementwise VPU/EUP ops on dense slabs.
        lg = [logits_ref[c].astype(f32) for c in range(C)]
        sg = [semseg_ref[c].astype(f32) for c in range(C)]

        def accumulate(lgs, sgs, valid):
            # per-pixel log-sum-exp over channels
            m = lgs[0]
            for c in range(1, C):
                m = jnp.maximum(m, lgs[c])
            ex = jnp.exp(lgs[0] - m)
            for c in range(1, C):
                ex = ex + jnp.exp(lgs[c] - m)
            lse = m + jnp.log(ex)
            # logit at argmax_c(semseg): first max wins (torch.argmax semantics)
            smax = sgs[0]
            for c in range(1, C):
                smax = jnp.maximum(smax, sgs[c])
            tgt = lgs[C - 1]
            for c in range(C - 2, -1, -1):
                tgt = jnp.where(sgs[c] == smax, lgs[c], tgt)
            ce = lse - tgt
            if valid is not None:
                ce = jnp.where(valid, ce, jnp.zeros_like(ce))
            # Sublane pre-reduce, then tiny (8, Tw) accumulator RMW.
            acc_ref[0] += reduce_rows(ce)
            acc_ref[1] += reduce_rows(lgs[0] * sgs[0])
            acc_ref[2] += reduce_rows(lgs[0])
            acc_ref[3] += reduce_rows(sgs[0])
            acc_ref[4] += reduce_rows(lgs[1] * sgs[1])
            acc_ref[5] += reduce_rows(lgs[1])
            acc_ref[6] += reduce_rows(sgs[1])

        if needs_mask:
            gh = pl.program_id(1) * hb_local + h        # global H-block index
            h_edge = gh == hb_total - 1
            w_edge = w == pl.num_programs(3) - 1
            if ragged_h and ragged_w:
                is_edge = h_edge | w_edge
            elif ragged_h:
                is_edge = h_edge
            else:
                is_edge = w_edge

            @pl.when(is_edge)
            def _():
                row = gh * Th + lax.broadcasted_iota(jnp.int32, (Th, Tw), 0)
                col = w * Tw + lax.broadcasted_iota(jnp.int32, (Th, Tw), 1)
                valid = (row < H) & (col < W)
                zero = jnp.zeros((Th, Tw), f32)
                # Zero the raw slabs so the exp/log chain never sees padding.
                accumulate([jnp.where(valid, x, zero) for x in lg],
                           [jnp.where(valid, x, zero) for x in sg],
                           valid)

            @pl.when(jnp.logical_not(is_edge))
            def _():
                accumulate(lg, sg, None)
        else:
            accumulate(lg, sg, None)

        @pl.when((h == pl.num_programs(2) - 1) & (w == pl.num_programs(3) - 1))
        def _():
            # Collapse the accumulator to 8 scalars once per (batch, H-half).
            red = jnp.sum(acc_ref[...], axis=2)           # (8, TR)
            red = jnp.sum(red, axis=1, keepdims=True)     # (8, 1)
            out_ref[...] = jnp.broadcast_to(red, out_ref.shape)

    return kernel


def _lane_dense_layout(H, W):
    """For odd / narrow widths: refactor the flattened pixel count P = H*W into
    (Hf, Wf) with Wf a multiple of 128 (a free reshape; the loss is pixel-order
    independent).  Returns (Hf, Wf) or None to keep the original layout."""
    if W >= 128 and W % 128 == 0:
        return None
    P = H * W
    best = None
    wf = 128
    while wf <= min(P, 4096):
        if P % wf == 0:
            hf = P // wf
            key = (hf % 8 == 0, wf)      # prefer full-sublane rows, then wider rows
            if best is None or key > best[0]:
                best = (key, (hf, wf))
        wf += 128
    return None if best is None else best[1]


def _choose_tiles(Hk, Wk, bytes_per_px, sub):
    """Largest tiles under the double-buffered-input budget / slab-pixel cap.
    Prefers Tw = full row width (contiguous DMA runs); Th multiple of `sub`."""
    def th_cap(tw):
        return min(IN_BUDGET // (2 * tw * bytes_per_px), MAX_TILE_PX // tw)

    if th_cap(Wk) >= min(Hk, sub):
        Tw = Wk
    else:
        tw = min(IN_BUDGET // (2 * sub * bytes_per_px), MAX_TILE_PX // sub, Wk)
        Tw = max(128, (tw // 128) * 128)

    cap = th_cap(Tw)
    if Hk <= cap and (Hk % sub == 0 or Hk < sub):
        Th = Hk                                        # full extent: always legal
    else:
        Th = max(sub, (min(cap, 256, Hk) // sub) * sub)
    return Th, Tw


@functools.partial(jax.jit, static_argnames=("smooth", "_tile_override"))
def softmax_dice_loss(logits, semseg, *, smooth=SMOOTH, _tile_override=None):
    """logits, semseg: (N, C, H, W) arrays (NCHW, like the PyTorch module).
    Dtypes may be f32 / bf16 / int8; accumulation is always f32."""
    N, C, H, W = logits.shape
    assert semseg.shape == logits.shape and C >= 2
    total_px = H * W

    # Lane-dense relayout for small / odd widths (free reshape).
    fac = _lane_dense_layout(H, W)
    if fac is not None:
        Hk, Wk = fac
        logits_k = logits.reshape(N, C, Hk, Wk)
        semseg_k = semseg.reshape(N, C, Hk, Wk)
    else:
        Hk, Wk = H, W
        logits_k, semseg_k = logits, semseg

    sz_l = np.dtype(logits.dtype).itemsize
    sz_s = np.dtype(semseg.dtype).itemsize
    sub = max(8, 32 // sz_l, 32 // sz_s)    # sublane quantum: 8 f32, 16 bf16, 32 int8
    if _tile_override is not None:
        Th, Tw = _tile_override
    else:
        Th, Tw = _choose_tiles(Hk, Wk, C * (sz_l + sz_s), sub)

    hb_total = pl.cdiv(Hk, Th)
    wb = pl.cdiv(Wk, Tw)
    # 2-way H split across TensorCores (v7x) when it divides evenly.
    if hb_total >= 2 and hb_total % 2 == 0:
        ns, hb_local = 2, hb_total // 2
    else:
        ns, hb_local = 1, hb_total
    ragged_h = Hk % Th != 0
    ragged_w = Wk % Tw != 0
    TR = 8 if Th % 8 == 0 else Th

    kernel = _make_kernel(C, Th, Tw, Hk, Wk, hb_local, hb_total, ragged_h, ragged_w)

    def in_spec():
        return pl.BlockSpec((pl.Squeezed(), C, Th, Tw),
                            lambda n, s, h, w: (n, 0, s * hb_local + h, w))

    out = pl.pallas_call(
        kernel,
        out_shape=jax.ShapeDtypeStruct((N, ns, 8, 128), jnp.float32),
        grid_spec=pltpu.PrefetchScalarGridSpec(
            num_scalar_prefetch=0,
            grid=(N, ns, hb_local, wb),
            in_specs=[in_spec(), in_spec()],
            out_specs=pl.BlockSpec((pl.Squeezed(), pl.Squeezed(), 8, 128),
                                   lambda n, s, h, w: (n, s, 0, 0)),
            scratch_shapes=[pltpu.VMEM((8, TR, Tw), jnp.float32)],
        ),
        compiler_params=pltpu.CompilerParams(
            dimension_semantics=("parallel", "parallel", "arbitrary", "arbitrary"),
            vmem_limit_bytes=VMEM_LIMIT),
    )(logits_k, semseg_k)

    # Cheap JAX epilogue on (N, ns, 8) partial sums.
    totals = jnp.sum(out[:, :, :, 0], axis=(0, 1))        # (8,)
    ce_mean = totals[0] / (N * total_px)
    dice0 = (2.0 * totals[1] + smooth) / (totals[2] + totals[3] + smooth)
    dice1 = (2.0 * totals[4] + smooth) / (totals[5] + totals[6] + smooth)
    return 0.6 * ce_mean + 0.2 * (1.0 - dice0) + 0.2 * (1.0 - dice1)


def _reference(logits, semseg, smooth=SMOOTH):
    """Pure-JAX mirror of the PyTorch module (for correctness checks)."""
    tgt = jnp.argmax(semseg, axis=1)
    logp = jax.nn.log_softmax(logits, axis=1)
    ce = -jnp.mean(jnp.take_along_axis(logp, tgt[:, None], axis=1))

    def dice_loss(p, t):
        p = p.reshape(-1)
        t = t.reshape(-1)
        inter = jnp.sum(p * t)
        return 1.0 - (2.0 * inter + smooth) / (jnp.sum(p) + jnp.sum(t) + smooth)

    return (0.6 * ce
            + 0.2 * dice_loss(logits[:, 0], semseg[:, 0])
            + 0.2 * dice_loss(logits[:, 1], semseg[:, 1]))


if __name__ == "__main__":
    key = jax.random.PRNGKey(0)
    k1, k2, k3, k4 = jax.random.split(key, 4)

    def one_hot_nchw(classes, C, dtype=jnp.float32):
        return jnp.transpose(jax.nn.one_hot(classes, C, dtype=dtype), (0, 3, 1, 2))

    N, C = 2, 3   # C=3: cell / overlapping cell wall / background

    # 1) Tiny square map -> lane-dense flatten path (16x16 pixels -> (1, 256)).
    H, W = 16, 16
    logits = jax.random.normal(k1, (N, C, H, W), dtype=jnp.float32)
    semseg = one_hot_nchw(jax.random.randint(k2, (N, H, W), 0, C), C)
    loss = jax.block_until_ready(softmax_dice_loss(logits, semseg))
    ref = _reference(logits, semseg)
    assert jnp.allclose(loss, ref, atol=2e-5, rtol=2e-5), (loss, ref)

    # 2) Wide map, full-width single-block tiles, bf16 streaming dtypes.
    H2, W2 = 16, 640
    logits2 = jax.random.normal(k3, (N, C, H2, W2), dtype=jnp.float32)
    semseg2 = one_hot_nchw(jax.random.randint(k2, (N, H2, W2), 0, C), C)
    l2 = logits2.astype(jnp.bfloat16)
    s2 = semseg2.astype(jnp.bfloat16)
    loss2 = jax.block_until_ready(softmax_dice_loss(l2, s2))
    ref2 = _reference(l2.astype(jnp.float32), s2.astype(jnp.float32))
    assert jnp.allclose(loss2, ref2, atol=2e-4, rtol=2e-4), (loss2, ref2)

    # 3) Ragged H and W edges + 2-way H split + multi-block accumulation,
    #    forced via small tiles so those code paths are exercised at test size.
    H3, W3 = 60, 300
    logits3 = jax.random.normal(k4, (N, C, H3, W3), dtype=jnp.float32)
    semseg3 = one_hot_nchw(jax.random.randint(k2, (N, H3, W3), 0, C), C)
    loss3 = jax.block_until_ready(
        softmax_dice_loss(logits3, semseg3, _tile_override=(16, 128)))
    ref3 = _reference(logits3, semseg3)
    assert jnp.allclose(loss3, ref3, atol=2e-5, rtol=2e-5), (loss3, ref3)

    print("KERNEL_OK")
</pallas_src>

<mosaic_0001>
module attributes {stable_mosaic.version = 11 : i64} {
  func.func @kernel(%arg0: i32, %arg1: i32, %arg2: i32, %arg3: i32, %arg4: memref<1x3x1x256xf32, #tpu.memory_space<vmem>>, %arg5: memref<1x3x1x256xf32, #tpu.memory_space<vmem>>, %arg6: memref<1x1x8x128xf32, #tpu.memory_space<vmem>>, %arg7: memref<8x1x256xf32, #tpu.memory_space<vmem>>) attributes {dimension_semantics = [#tpu.dimension_semantics<parallel>, #tpu.dimension_semantics<parallel>, #tpu.dimension_semantics<arbitrary>, #tpu.dimension_semantics<arbitrary>], iteration_bounds = array<i64: 2, 1, 1, 1>, scalar_prefetch = 0 : i64, scratch_operands = 1 : i64, tpu.core_type = #tpu.core_type<tc>, window_params = [{transform_indices = @transform_0, window_bounds = array<i64: 1, 3, 1, 256>}, {transform_indices = @transform_1, window_bounds = array<i64: 1, 3, 1, 256>}, {transform_indices = @transform_2, window_bounds = array<i64: 1, 1, 8, 128>}]} {
    %c0_i32 = arith.constant 0 : i32
    %0 = arith.cmpi eq, %arg2, %c0_i32 : i32
    %c0_i32_0 = arith.constant 0 : i32
    %1 = arith.cmpi eq, %arg3, %c0_i32_0 : i32
    %2 = arith.andi %0, %1 : i1
    %3 = arith.extui %2 : i1 to i32
    %c0_i32_1 = arith.constant 0 : i32
    %4 = arith.cmpi ne, %3, %c0_i32_1 : i32
    scf.if %4 {
      %cst = arith.constant 0.000000e+00 : f32
      %85 = vector.broadcast %cst : f32 to vector<8x1x256xf32>
      %c0_64 = arith.constant 0 : index
      %c0_65 = arith.constant 0 : index
      %c0_66 = arith.constant 0 : index
      %86 = vector.load %arg7[%c0_64, %c0_65, %c0_66] : memref<8x1x256xf32, #tpu.memory_space<vmem>>, vector<8x1x256xf32>
      tpu.vector_store %arg7[%c0_64, %c0_65, %c0_66], %85 {strides = array<i32>} : memref<8x1x256xf32, #tpu.memory_space<vmem>>, vector<8x1x256xf32>,
    } else {
    }
    %c0 = arith.constant 0 : index
    %c0_2 = arith.constant 0 : index
    %c0_3 = arith.constant 0 : index
    %c0_4 = arith.constant 0 : index
    %5 = vector.load %arg4[%c0, %c0_2, %c0_3, %c0_4] : memref<1x3x1x256xf32, #tpu.memory_space<vmem>>, vector<1x1x1x256xf32>
    %6 = vector.shape_cast %5 : vector<1x1x1x256xf32> to vector<1x256xf32>
    %c0_5 = arith.constant 0 : index
    %c1 = arith.constant 1 : index
    %c0_6 = arith.constant 0 : index
    %c0_7 = arith.constant 0 : index
    %7 = vector.load %arg4[%c0_5, %c1, %c0_6, %c0_7] : memref<1x3x1x256xf32, #tpu.memory_space<vmem>>, vector<1x1x1x256xf32>
    %8 = vector.shape_cast %7 : vector<1x1x1x256xf32> to vector<1x256xf32>
    %c0_8 = arith.constant 0 : index
    %c2 = arith.constant 2 : index
    %c0_9 = arith.constant 0 : index
    %c0_10 = arith.constant 0 : index
    %9 = vector.load %arg4[%c0_8, %c2, %c0_9, %c0_10] : memref<1x3x1x256xf32, #tpu.memory_space<vmem>>, vector<1x1x1x256xf32>
    %10 = vector.shape_cast %9 : vector<1x1x1x256xf32> to vector<1x256xf32>
    %c0_11 = arith.constant 0 : index
    %c0_12 = arith.constant 0 : index
    %c0_13 = arith.constant 0 : index
    %c0_14 = arith.constant 0 : index
    %11 = vector.load %arg5[%c0_11, %c0_12, %c0_13, %c0_14] : memref<1x3x1x256xf32, #tpu.memory_space<vmem>>, vector<1x1x1x256xf32>
    %12 = vector.shape_cast %11 : vector<1x1x1x256xf32> to vector<1x256xf32>
    %c0_15 = arith.constant 0 : index
    %c1_16 = arith.constant 1 : index
    %c0_17 = arith.constant 0 : index
    %c0_18 = arith.constant 0 : index
    %13 = vector.load %arg5[%c0_15, %c1_16, %c0_17, %c0_18] : memref<1x3x1x256xf32, #tpu.memory_space<vmem>>, vector<1x1x1x256xf32>
    %14 = vector.shape_cast %13 : vector<1x1x1x256xf32> to vector<1x256xf32>
    %c0_19 = arith.constant 0 : index
    %c2_20 = arith.constant 2 : index
    %c0_21 = arith.constant 0 : index
    %c0_22 = arith.constant 0 : index
    %15 = vector.load %arg5[%c0_19, %c2_20, %c0_21, %c0_22] : memref<1x3x1x256xf32, #tpu.memory_space<vmem>>, vector<1x1x1x256xf32>
    %16 = vector.shape_cast %15 : vector<1x1x1x256xf32> to vector<1x256xf32>
    %17 = arith.maximumf %6, %8 : vector<1x256xf32>
    %18 = arith.maximumf %17, %10 : vector<1x256xf32>
    %19 = arith.subf %6, %18 : vector<1x256xf32>
    %20 = math.exp %19 : vector<1x256xf32>
    %21 = arith.subf %8, %18 : vector<1x256xf32>
    %22 = math.exp %21 : vector<1x256xf32>
    %23 = arith.addf %20, %22 : vector<1x256xf32>
    %24 = arith.subf %10, %18 : vector<1x256xf32>
    %25 = math.exp %24 : vector<1x256xf32>
    %26 = arith.addf %23, %25 : vector<1x256xf32>
    %27 = math.log %26 : vector<1x256xf32>
    %28 = arith.addf %18, %27 : vector<1x256xf32>
    %29 = arith.maximumf %12, %14 : vector<1x256xf32>
    %30 = arith.maximumf %29, %16 : vector<1x256xf32>
    %31 = arith.cmpf oeq, %14, %30 : vector<1x256xf32>
    %32 = arith.select %31, %8, %10 : vector<1x256xi1>, vector<1x256xf32>
    %33 = arith.cmpf oeq, %12, %30 : vector<1x256xf32>
    %34 = arith.select %33, %6, %32 : vector<1x256xi1>, vector<1x256xf32>
    %35 = arith.subf %28, %34 : vector<1x256xf32>
    %c0_23 = arith.constant 0 : index
    %c0_24 = arith.constant 0 : index
    %c0_25 = arith.constant 0 : index
    %36 = vector.load %arg7[%c0_23, %c0_24, %c0_25] : memref<8x1x256xf32, #tpu.memory_space<vmem>>, vector<1x1x256xf32>
    %37 = vector.shape_cast %36 : vector<1x1x256xf32> to vector<1x256xf32>
    %38 = arith.addf %37, %35 : vector<1x256xf32>
    %c0_26 = arith.constant 0 : index
    %c0_27 = arith.constant 0 : index
    %c0_28 = arith.constant 0 : index
    %39 = vector.load %arg7[%c0_26, %c0_27, %c0_28] : memref<8x1x256xf32, #tpu.memory_space<vmem>>, vector<1x1x256xf32>
    %40 = vector.shape_cast %39 : vector<1x1x256xf32> to vector<1x256xf32>
    %41 = vector.shape_cast %38 : vector<1x256xf32> to vector<1x1x256xf32>
    tpu.vector_store %arg7[%c0_26, %c0_27, %c0_28], %41 {strides = array<i32>} : memref<8x1x256xf32, #tpu.memory_space<vmem>>, vector<1x1x256xf32>,
    %c1_29 = arith.constant 1 : index
    %c0_30 = arith.constant 0 : index
    %c0_31 = arith.constant 0 : index
    %42 = vector.load %arg7[%c1_29, %c0_30, %c0_31] : memref<8x1x256xf32, #tpu.memory_space<vmem>>, vector<1x1x256xf32>
    %43 = vector.shape_cast %42 : vector<1x1x256xf32> to vector<1x256xf32>
    %44 = arith.mulf %6, %12 : vector<1x256xf32>
    %45 = arith.addf %43, %44 : vector<1x256xf32>
    %c1_32 = arith.constant 1 : index
    %c0_33 = arith.constant 0 : index
    %c0_34 = arith.constant 0 : index
    %46 = vector.load %arg7[%c1_32, %c0_33, %c0_34] : memref<8x1x256xf32, #tpu.memory_space<vmem>>, vector<1x1x256xf32>
    %47 = vector.shape_cast %46 : vector<1x1x256xf32> to vector<1x256xf32>
    %48 = vector.shape_cast %45 : vector<1x256xf32> to vector<1x1x256xf32>
    tpu.vector_store %arg7[%c1_32, %c0_33, %c0_34], %48 {strides = array<i32>} : memref<8x1x256xf32, #tpu.memory_space<vmem>>, vector<1x1x256xf32>,
    %c2_35 = arith.constant 2 : index
    %c0_36 = arith.constant 0 : index
    %c0_37 = arith.constant 0 : index
    %49 = vector.load %arg7[%c2_35, %c0_36, %c0_37] : memref<8x1x256xf32, #tpu.memory_space<vmem>>, vector<1x1x256xf32>
    %50 = vector.shape_cast %49 : vector<1x1x256xf32> to vector<1x256xf32>
    %51 = arith.addf %50, %6 : vector<1x256xf32>
    %c2_38 = arith.constant 2 : index
    %c0_39 = arith.constant 0 : index
    %c0_40 = arith.constant 0 : index
    %52 = vector.load %arg7[%c2_38, %c0_39, %c0_40] : memref<8x1x256xf32, #tpu.memory_space<vmem>>, vector<1x1x256xf32>
    %53 = vector.shape_cast %52 : vector<1x1x256xf32> to vector<1x256xf32>
    %54 = vector.shape_cast %51 : vector<1x256xf32> to vector<1x1x256xf32>
    tpu.vector_store %arg7[%c2_38, %c0_39, %c0_40], %54 {strides = array<i32>} : memref<8x1x256xf32, #tpu.memory_space<vmem>>, vector<1x1x256xf32>,
    %c3 = arith.constant 3 : index
    %c0_41 = arith.constant 0 : index
    %c0_42 = arith.constant 0 : index
    %55 = vector.load %arg7[%c3, %c0_41, %c0_42] : memref<8x1x256xf32, #tpu.memory_space<vmem>>, vector<1x1x256xf32>
    %56 = vector.shape_cast %55 : vector<1x1x256xf32> to vector<1x256xf32>
    %57 = arith.addf %56, %12 : vector<1x256xf32>
    %c3_43 = arith.constant 3 : index
    %c0_44 = arith.constant 0 : index
    %c0_45 = arith.constant 0 : index
    %58 = vector.load %arg7[%c3_43, %c0_44, %c0_45] : memref<8x1x256xf32, #tpu.memory_space<vmem>>, vector<1x1x256xf32>
    %59 = vector.shape_cast %58 : vector<1x1x256xf32> to vector<1x256xf32>
    %60 = vector.shape_cast %57 : vector<1x256xf32> to vector<1x1x256xf32>
    tpu.vector_store %arg7[%c3_43, %c0_44, %c0_45], %60 {strides = array<i32>} : memref<8x1x256xf32, #tpu.memory_space<vmem>>, vector<1x1x256xf32>,
    %c4 = arith.constant 4 : index
    %c0_46 = arith.constant 0 : index
    %c0_47 = arith.constant 0 : index
    %61 = vector.load %arg7[%c4, %c0_46, %c0_47] : memref<8x1x256xf32, #tpu.memory_space<vmem>>, vector<1x1x256xf32>
    %62 = vector.shape_cast %61 : vector<1x1x256xf32> to vector<1x256xf32>
    %63 = arith.mulf %8, %14 : vector<1x256xf32>
    %64 = arith.addf %62, %63 : vector<1x256xf32>
    %c4_48 = arith.constant 4 : index
    %c0_49 = arith.constant 0 : index
    %c0_50 = arith.constant 0 : index
    %65 = vector.load %arg7[%c4_48, %c0_49, %c0_50] : memref<8x1x256xf32, #tpu.memory_space<vmem>>, vector<1x1x256xf32>
    %66 = vector.shape_cast %65 : vector<1x1x256xf32> to vector<1x256xf32>
    %67 = vector.shape_cast %64 : vector<1x256xf32> to vector<1x1x256xf32>
    tpu.vector_store %arg7[%c4_48, %c0_49, %c0_50], %67 {strides = array<i32>} : memref<8x1x256xf32, #tpu.memory_space<vmem>>, vector<1x1x256xf32>,
    %c5 = arith.constant 5 : index
    %c0_51 = arith.constant 0 : index
    %c0_52 = arith.constant 0 : index
    %68 = vector.load %arg7[%c5, %c0_51, %c0_52] : memref<8x1x256xf32, #tpu.memory_space<vmem>>, vector<1x1x256xf32>
    %69 = vector.shape_cast %68 : vector<1x1x256xf32> to vector<1x256xf32>
    %70 = arith.addf %69, %8 : vector<1x256xf32>
    %c5_53 = arith.constant 5 : index
    %c0_54 = arith.constant 0 : index
    %c0_55 = arith.constant 0 : index
    %71 = vector.load %arg7[%c5_53, %c0_54, %c0_55] : memref<8x1x256xf32, #tpu.memory_space<vmem>>, vector<1x1x256xf32>
    %72 = vector.shape_cast %71 : vector<1x1x256xf32> to vector<1x256xf32>
    %73 = vector.shape_cast %70 : vector<1x256xf32> to vector<1x1x256xf32>
    tpu.vector_store %arg7[%c5_53, %c0_54, %c0_55], %73 {strides = array<i32>} : memref<8x1x256xf32, #tpu.memory_space<vmem>>, vector<1x1x256xf32>,
    %c6 = arith.constant 6 : index
    %c0_56 = arith.constant 0 : index
    %c0_57 = arith.constant 0 : index
    %74 = vector.load %arg7[%c6, %c0_56, %c0_57] : memref<8x1x256xf32, #tpu.memory_space<vmem>>, vector<1x1x256xf32>
    %75 = vector.shape_cast %74 : vector<1x1x256xf32> to vector<1x256xf32>
    %76 = arith.addf %75, %14 : vector<1x256xf32>
    %c6_58 = arith.constant 6 : index
    %c0_59 = arith.constant 0 : index
    %c0_60 = arith.constant 0 : index
    %77 = vector.load %arg7[%c6_58, %c0_59, %c0_60] : memref<8x1x256xf32, #tpu.memory_space<vmem>>, vector<1x1x256xf32>
    %78 = vector.shape_cast %77 : vector<1x1x256xf32> to vector<1x256xf32>
    %79 = vector.shape_cast %76 : vector<1x256xf32> to vector<1x1x256xf32>
    tpu.vector_store %arg7[%c6_58, %c0_59, %c0_60], %79 {strides = array<i32>} : memref<8x1x256xf32, #tpu.memory_space<vmem>>, vector<1x1x256xf32>,
    %c0_i32_61 = arith.constant 0 : i32
    %80 = arith.cmpi eq, %arg2, %c0_i32_61 : i32
    %c0_i32_62 = arith.constant 0 : i32
    %81 = arith.cmpi eq, %arg3, %c0_i32_62 : i32
    %82 = arith.andi %80, %81 : i1
    %83 = arith.extui %82 : i1 to i32
    %c0_i32_63 = arith.constant 0 : i32
    %84 = arith.cmpi ne, %83, %c0_i32_63 : i32
    scf.if %84 {
      %c0_64 = arith.constant 0 : index
      %c0_65 = arith.constant 0 : index
      %c0_66 = arith.constant 0 : index
      %85 = vector.load %arg7[%c0_64, %c0_65, %c0_66] : memref<8x1x256xf32, #tpu.memory_space<vmem>>, vector<8x1x256xf32>
      %cst = arith.constant dense<0.000000e+00> : vector<8x1xf32>
      %86 = vector.multi_reduction <add>, %85, %cst [2] : vector<8x1x256xf32> to vector<8x1xf32>
      %cst_67 = arith.constant dense<0.000000e+00> : vector<8xf32>
      %87 = vector.multi_reduction <add>, %86, %cst_67 [1] : vector<8x1xf32> to vector<8xf32>
      %88 = vector.shape_cast %87 : vector<8xf32> to vector<8x1xf32>
      %89 = vector.shape_cast %88 : vector<8x1xf32> to vector<8x1xf32>
      %90 = vector.broadcast %89 : vector<8x1xf32> to vector<8x128xf32>
      %c0_68 = arith.constant 0 : index
      %c0_69 = arith.constant 0 : index
      %c0_70 = arith.constant 0 : index
      %c0_71 = arith.constant 0 : index
      %91 = vector.load %arg6[%c0_68, %c0_69, %c0_70, %c0_71] : memref<1x1x8x128xf32, #tpu.memory_space<vmem>>, vector<1x1x8x128xf32>
      %92 = vector.shape_cast %91 : vector<1x1x8x128xf32> to vector<8x128xf32>
      %93 = vector.shape_cast %90 : vector<8x128xf32> to vector<1x1x8x128xf32>
      tpu.vector_store %arg6[%c0_68, %c0_69, %c0_70, %c0_71], %93 {strides = array<i32>} : memref<1x1x8x128xf32, #tpu.memory_space<vmem>>, vector<1x1x8x128xf32>,
    } else {
    }
    return
  }
  func.func @transform_0(%arg0: i32, %arg1: i32, %arg2: i32, %arg3: i32) -> (i32, i32, i32, i32) {
    %c1_i32 = arith.constant 1 : i32
    %0 = arith.muli %arg1, %c1_i32 : i32
    %1 = arith.addi %0, %arg2 : i32
    %c0_i32 = arith.constant 0 : i32
    %c0_i32_0 = arith.constant 0 : i32
    return %arg0, %c0_i32, %1, %arg3 : i32, i32, i32, i32
  }
  func.func @transform_1(%arg0: i32, %arg1: i32, %arg2: i32, %arg3: i32) -> (i32, i32, i32, i32) {
    %c1_i32 = arith.constant 1 : i32
    %0 = arith.muli %arg1, %c1_i32 : i32
    %1 = arith.addi %0, %arg2 : i32
    %c0_i32 = arith.constant 0 : i32
    %c0_i32_0 = arith.constant 0 : i32
    return %arg0, %c0_i32, %1, %arg3 : i32, i32, i32, i32
  }
  func.func @transform_2(%arg0: i32, %arg1: i32, %arg2: i32, %arg3: i32) -> (i32, i32, i32, i32) {
    %c0_i32 = arith.constant 0 : i32
    %c0_i32_0 = arith.constant 0 : i32
    %c0_i32_1 = arith.constant 0 : i32
    return %arg0, %arg1, %c0_i32, %c0_i32_0 : i32, i32, i32, i32
  }
}

</mosaic_0001>

<bundles_post_ra>
// kernel: softmax_dice_loss.1
= control target key start
LH: loop header
LB: loop body
LE: loop exit
PB: predicated region body
PF: predicated region fallthrough
CT: control target
= control target key end

     0   :  { %s719_s9 = smov 0   ;;  %s721_s10 = smov 0   ;;  %s871_s0 = inlined_call_operand.vmem [shape: f32[2,3,1,256], index: 0, kind: input, shape index: {}]   ;;  %s872_s1 = inlined_call_operand.vmem [shape: f32[2,3,1,256], index: 1, kind: input, shape index: {}]   ;;  %s873_s2 = inlined_call_operand.vmem [shape: f32[2,1,8,128], index: 2, kind: output, shape index: {}]  }
   0x1   :  { %s723_s11 = smov 0  }
   0x2 LB: > { %s38_s12 = sadd.s32 1, %s697_s10  ;;  %p637_p0 = scmp.ge.s32.totalorder %s701_s11, 1  ;;  %s701_s11 = sphi %s723_s11, %s12_s11   ;;  %s697_s10 = sphi %s721_s10, %s877_s10   ;;  %s693_s9 = sphi %s719_s9, %s876_s9  }
   0x3   : > { %p40_p1 = scmp.ge.s32.totalorder %s38_s12, 2  ;;  %p182_p2 = scmp.lt.s32.totalorder %s701_s11, 3 }
   0x5   : > { %s879_s12 = smov (%p40_p1, %s38_s12), 0  ;;  %p183_p3 = pnand %p637_p0, %p182_p2 }
   0x6   : > { %p229_p4 = scmp.lt.s32.totalorder (!%p183_p3), %s693_s9, 1  ;;  %v270_v0 = vlaneseq (!%p183_p3)  ;;  %v703_v2 = vmov (!%p183_p3), 0.0   ;;  %vm446_vm1 = vcmask (!%p183_p3), 1040384   ;;  %vm504_vm4 = vcmask (!%p183_p3), 1041409  }
   0x7   : > { %186 = sbr.rel (%p183_p3) target bundleno = 225 (0xe1), region = 28  ;;  %vm507_vm5 = vcmask (!%p183_p3), 1042434   ;;  %vm510_vm6 = vcmask (!%p183_p3), 1043459   ;;  %vm513_vm7 = vcmask (!%p183_p3), 1044484   ;;  %vm516_vm8 = vcmask (!%p183_p3), 1045509  }
   0x8   : > { %vm739_vm0 = vcmp.lt.s32.totalorder (!%p183_p3), %v270_v0, 256  ;;  %v367_v25 = vshrl.u32 (!%p183_p3), %v270_v0, 7  ;;  %vm519_vm9 = vcmask (!%p183_p3), 1046534   ;;  %vm522_vm10 = vcmask (!%p183_p3), 1047559  }
   0x9   : > { %275 = vst.msk [vmem:[#allocation2 + $0x2] sm:$0x3] (!%p183_p3), %vm739_vm0, %v703_v2  ;;  %274 = vst.msk [vmem:[#allocation2] sm:$0x3] (!%p183_p3), %vm739_vm0, %v703_v2 }
   0xa   : > { %276 = vst.msk [vmem:[#allocation2 + $0x4] sm:$0x3] (!%p183_p3), %vm739_vm0, %v703_v2  ;;  %277 = vst.msk [vmem:[#allocation2 + $0x6] sm:$0x3] (!%p183_p3), %vm739_vm0, %v703_v2  ;;  %v811_v31 = vsub.s32 (!%p183_p3), 0, %v367_v25  ;;  %v813_v32 = vsub.s32 (!%p183_p3), 1, %v367_v25 }
   0xb   : > { %278 = vst.msk [vmem:[#allocation2 + $0x8] sm:$0x3] (!%p183_p3), %vm739_vm0, %v703_v2  ;;  %279 = vst.msk [vmem:[#allocation2 + $0xa] sm:$0x3] (!%p183_p3), %vm739_vm0, %v703_v2 }
   0xc   : > { %280 = vst.msk [vmem:[#allocation2 + $0xc] sm:$0x3] (!%p183_p3), %vm739_vm0, %v703_v2  ;;  %281 = vst.msk [vmem:[#allocation2 + $0xe] sm:$0x3] (!%p183_p3), %vm739_vm0, %v703_v2 }
   0xe   : > { %s881_s9 = smov (!%p229_p4, %s693_s9), 1 }
   0xf   : > { %s645_s13 = smul.u32 6, %s881_s9  ;;  %s638_s20 = sshll.u32 %s881_s9, 3 }
  0x10   : > { %v323_v11 = vld [vmem:[#allocation2 + $0x2] sm:$0x3]  ;;  %v315_v25 = vld [vmem:[#allocation2] sm:$0x3]  ;;  %s263_s23 = scalar_lea.vmem %s873_s2, %s638_s20 }
  0x11   : > { %s239_s16 = scalar_lea.vmem %s871_s0, %s645_s13  ;;  %s766_s19 = scalar_lea.vmem %s872_s1, %s645_s13  ;;  %v332_v12 = vld [vmem:[#allocation2 + $0x6] sm:$0x3]  ;;  %v328_v13 = vld [vmem:[#allocation2 + $0x4] sm:$0x3] }
  0x12   : > { %v768_v3 = vld [vmem:[%s239_s16] sm:$0x3]  ;;  %v773_v5 = vld [vmem:[%s239_s16 + $0x2] sm:$0x3]  ;;  %v780_v8 = vld [vmem:[%s239_s16 + $0x4] sm:$0x3] }
  0x13   : > { %v771_v4 = vld [vmem:[%s766_s19] sm:$0x3]  ;;  %v778_v7 = vld [vmem:[%s766_s19 + $0x2] sm:$0x3]  ;;  %v292_v9 = vmax.f32 %v768_v3, %v773_v5  ;;  %v329_v17 = vadd.f32 %v328_v13, %v768_v3  ;;  %v341_v18 = vld [vmem:[#allocation2 + $0xa] sm:$0x3] }
  0x14   : > { %v324_v6 = vmul.f32 %v771_v4, %v768_v3  ;;  %v337_v10 = vmul.f32 %v778_v7, %v773_v5  ;;  %v333_v16 = vadd.f32 %v332_v12, %v771_v4  ;;  %v336_v19 = vld [vmem:[#allocation2 + $0x8] sm:$0x3]  ;;  %v342_v20 = vadd.f32 %v773_v5, %v341_v18  ;;  %v345_v24 = vld [vmem:[#allocation2 + $0xc] sm:$0x3] }
  0x15   : > { %v787_v14 = vmax.f32 %v292_v9, %v780_v8  ;;  %330 = vst.msk [vmem:[#allocation2 + $0x4] sm:$0x3] %vm739_vm0, %v329_v17  ;;  %v346_v27 = vadd.f32 %v778_v7, %v345_v24  ;;  %v308_v13 = vmax.f32 %v771_v4, %v778_v7 }
  0x16   : > { %v325_v15 = vadd.f32 %v324_v6, %v323_v11  ;;  %v338_v21 = vadd.f32 %v337_v10, %v336_v19  ;;  %334 = vst.msk [vmem:[#allocation2 + $0x6] sm:$0x3] %vm739_vm0, %v333_v16  ;;  %343 = vst.msk [vmem:[#allocation2 + $0xa] sm:$0x3] %vm739_vm0, %v342_v20 }
  0x17   : > { %v294_v22 = vsub.f32 %v768_v3, %v787_v14  ;;  %v297_v23 = vsub.f32 %v773_v5, %v787_v14  ;;  %v301_v26 = vsub.f32 %v780_v8, %v787_v14  ;;  %347 = vst.msk [vmem:[#allocation2 + $0xc] sm:$0x3] %vm739_vm0, %v346_v27 }
  0x18   : > { %326 = vst.msk [vmem:[#allocation2 + $0x2] sm:$0x3] %vm739_vm0, %v325_v15  ;;  %339 = vst.msk [vmem:[#allocation2 + $0x8] sm:$0x3] %vm739_vm0, %v338_v21  ;;  %v642_v15 = vld [vmem:[%s766_s19 + $0x4] sm:$0x3] }
  0x19   : > { %v295_v28 = vmul.f32 1.442695, %v294_v22  ;;  %v298_v29 = vmul.f32 1.442695, %v297_v23  ;;  %v302_v30 = vmul.f32 1.442695, %v301_v26  ;;  %v309_v18 = vmax.f32 %v308_v13, %v642_v15 }
  0x1b   : > { %671 = vpow2.f32 %v295_v28  ;;  %vm310_vm2 = vcmp.eq.f32.partialorder %v778_v7, %v309_v18  ;;  %vm312_vm3 = vcmp.eq.f32.partialorder %v771_v4, %v309_v18  ;;  %v357_v28 = vld [vmem:[#allocation2 + $0xe] sm:$0x3] }
  0x1c   : > { %673 = vpow2.f32 %v298_v29  ;;  %v352_v35 = vld [vmem:[#allocation2 + $0x4] sm:$0x3]  ;;  %v311_v20 = vsel %vm310_vm2, %v773_v5, %v780_v8  ;;  %v425_v7 = vrot.slane %v357_v28, %v811_v31  ;;  %v429_v29 = vrot.slane %v357_v28, %v813_v32 }
  0x1d   : > { %675 = vpow2.f32 %v302_v30  ;;  %v353_v34 = vld [vmem:[#allocation2 + $0x6] sm:$0x3]  ;;  %v355_v40 = vld [vmem:[#allocation2 + $0xa] sm:$0x3]  ;;  %v385_v41 = vrot.slane %v352_v35, %v811_v31  ;;  %v389_v42 = vrot.slane %v352_v35, %v813_v32  ;;  %v313_v23 = vsel %vm312_vm3, %v768_v3, %v311_v20 }
  0x1e   : > { %v393_v38 = vrot.slane %v353_v34, %v811_v31  ;;  %v397_v39 = vrot.slane %v353_v34, %v813_v32  ;;  %v409_v43 = vrot.slane %v355_v40, %v811_v31  ;;  %v413_v44 = vrot.slane %v355_v40, %v813_v32  ;;  %v356_v54 = vld [vmem:[#allocation2 + $0xc] sm:$0x3] }
  0x1f   : > { %v351_v33 = vld [vmem:[#allocation2 + $0x2] sm:$0x3]  ;;  %v354_v45 = vld [vmem:[#allocation2 + $0x8] sm:$0x3]  ;;  %v457_v52 = vsel %vm446_vm1, %v385_v41, 0.0  ;;  %v458_v53 = vsel %vm446_vm1, %v389_v42, 0.0  ;;  %v417_v0 = vrot.slane %v356_v54, %v811_v31  ;;  %v421_v2 = vrot.slane %v356_v54, %v813_v32 }
  0x20   : > { %v377_v36 = vrot.slane %v351_v33, %v811_v31  ;;  %v381_v37 = vrot.slane %v351_v33, %v813_v32  ;;  %v462_v48 = vsel %vm446_vm1, %v393_v38, 0.0  ;;  %v463_v49 = vsel %vm446_vm1, %v397_v39, 0.0 }
  0x21   : > { %v464_v51 = vadd.f32 %v463_v49, %v462_v48  ;;  %v472_v55 = vsel %vm446_vm1, %v409_v43, 0.0  ;;  %v473_v56 = vsel %vm446_vm1, %v413_v44, 0.0  ;;  %v401_v57 = vrot.slane %v354_v45, %v811_v31 }
  0x22   : > { %v452_v46 = vsel %vm446_vm1, %v377_v36, 0.0  ;;  %v453_v47 = vsel %vm446_vm1, %v381_v37, 0.0  ;;  %v459_v59 = vadd.f32 %v458_v53, %v457_v52  ;;  %v474_v60 = vadd.f32 %v473_v56, %v472_v55 }
  0x23   : > { %v454_v50 = vadd.f32 %v453_v47, %v452_v46  ;;  %465 = vadd.xlane.f32.xlu1 %v464_v51  ;;  %v405_v61 = vrot.slane %v354_v45, %v813_v32  ;;  %v467_v63 = vsel %vm446_vm1, %v401_v57, 0.0  ;;  %v477_v16 = vsel %vm446_vm1, %v417_v0, 0.0 }
  0x24   : > { %v478_v17 = vsel %vm446_vm1, %v421_v2, 0.0  ;;  %v482_v30 = vsel %vm446_vm1, %v425_v7, 0.0  ;;  %v483_v33 = vsel %vm446_vm1, %v429_v29, 0.0 }
  0x25   : > { %v672_v58 = vpop.eup %671  ;;  %455 = vadd.xlane.f32.xlu0 %v454_v50  ;;  %v468_v9 = vsel %vm446_vm1, %v405_v61, 0.0  ;;  %v479_v19 = vadd.f32 %v478_v17, %v477_v16  ;;  %v484_v34 = vadd.f32 %v483_v33, %v482_v30 }
  0x26   : > { %v674_v62 = vpop.eup %673  ;;  %v469_v11 = vadd.f32 %v468_v9, %v467_v63 }
  0x27   : > { %v676_v6 = vpop.eup %675  ;;  %v300_v10 = vadd.f32 %v674_v62, %v672_v58  ;;  %475 = vadd.xlane.f32.xlu1 %v474_v60 }
  0x29   : > { %460 = vadd.xlane.f32.xlu0 %v459_v59  ;;  %v304_v12 = vadd.f32 %v676_v6, %v300_v10 }
  0x2b   : > { %677 = vlog2.f32 %v304_v12 }
  0x2d   : > { %470 = vadd.xlane.f32.xlu0 %v469_v11 }
  0x31   : > { %480 = vadd.xlane.f32.xlu0 %v479_v19 }
  0x35   : > { %v678_v21 = vpop.eup %677 }
  0x36   : > { %v306_v22 = vmul.f32 0.6931472, %v678_v21 }
  0x38   : > { %v307_v24 = vadd.f32 %v306_v22, %v787_v14 }
  0x3a   : > { %v314_v26 = vsub.f32 %v307_v24, %v313_v23 }
  0x3c   : > { %v316_v27 = vadd.f32 %v315_v25, %v314_v26 }
  0x3e   : > { %321 = vst.msk [vmem:[#allocation2] sm:$0x3] %vm739_vm0, %v316_v27 }
  0x45   : > { %v350_v5 = vld [vmem:[#allocation2] sm:$0x3] }
  0x46   : > { %v369_v4 = vrot.slane %v350_v5, %v811_v31  ;;  %v373_v8 = vrot.slane %v350_v5, %v813_v32 }
  0x48   : > { %v447_v3 = vsel %vm446_vm1, %v369_v4, 0.0  ;;  %v448_v14 = vsel %vm446_vm1, %v373_v8, 0.0 }
  0x49   : > { %v449_v1 = vadd.f32 %v448_v14, %v447_v3 }
  0x4b   : > { %450 = vadd.xlane.f32.xlu1 %v449_v1 }
  0x4f   : > { %485 = vadd.xlane.f32.xlu1 %v484_v34 }
  0xb0   : > { %v466_v37 = vpop.xlane.xlu1 %465 }
  0xb1   : > { %v509_v42 = vrot.slane %v466_v37, 5 }
  0xb2   : > { %v456_v35 = vpop.xlane.xlu0 %455 }
  0xb3   : > { %v503_v32 = vrot.slane %v456_v35, 7 }
  0xb4   : > { %v476_v31 = vpop.xlane.xlu1 %475 }
  0xb5   : > { %v515_v47 = vrot.slane %v476_v31, 3 }
  0xb6   : > { %v461_v36 = vpop.xlane.xlu0 %460 }
  0xb7   : > { %v506_v40 = vrot.slane %v461_v36, 6 }
  0xba   : > { %v471_v38 = vpop.xlane.xlu0 %470 }
  0xbb   : > { %v512_v44 = vrot.slane %v471_v38, 4 }
  0xbe   : > { %v481_v39 = vpop.xlane.xlu0 %480 }
  0xbf   : > { %v518_v46 = vrot.slane %v481_v39, 2 }
  0xd8   : > { %v451_v41 = vpop.xlane.xlu1 %450 }
  0xd9   : > { %v505_v43 = vsel %vm504_vm4, %v503_v32, %v451_v41 }
  0xda   : > { %v508_v45 = vsel %vm507_vm5, %v506_v40, %v505_v43 }
  0xdb   : > { %v511_v48 = vsel %vm510_vm6, %v509_v42, %v508_v45 }
  0xdc   : > { %v514_v49 = vsel %vm513_vm7, %v512_v44, %v511_v48  ;;  %v486_v50 = vpop.xlane.xlu1 %485 }
  0xdd   : > { %v517_v51 = vsel %vm516_vm8, %v515_v47, %v514_v49  ;;  %v521_v52 = vrot.slane %v486_v50, 1 }
  0xde   : > { %v520_v53 = vsel %vm519_vm9, %v518_v46, %v517_v51 }
  0xdf   : > { %v523_v54 = vsel %vm522_vm10, %v521_v52, %v520_v53 }
  0xe0   : > { %525 = vst [vmem:[%s263_s23] sm:$0xff] %v523_v54 }
  0xe1 PF: > { %s12_s11 = sadd.s32 1, %s701_s11   ;;  %s876_s9 = smov %s697_s10 }
  0xe2   : > { %p9_p5 = scmp.ge.s32.totalorder %s12_s11, 4   ;;  %s877_s10 = smov %s879_s12 }
  0xe4   :  { %11 = sbr.rel (!%p9_p5) target bundleno = 2 (0x2), region = 79 }

</bundles_post_ra>
